<compile_context>
chip_gen: v7x
topology: tpu7x:2x2x1
jax: 0.10.0
libtpu: 0.0.40
codegen_flags: <defaults>
</compile_context>

<pallas_src>
import functools
from typing import NamedTuple

import numpy as np

import jax
import jax.numpy as jnp
from jax.experimental import pallas as pl
from jax.experimental.pallas import tpu as pltpu


def _round_up(x, m):
    return ((x + m - 1) // m) * m


# ----------------------------------------------------------------------------
# Kernel
# ----------------------------------------------------------------------------
def mean_aggregator_kernel(adj_ref, emb_ref, out_ref, *, d_col, tile_b,
                           emb_resident):
    """Grid = (i over node_num_a tiles [parallel], k over node_num_b tiles
    [arbitrary, trailing reduction]).

    adj_ref : (tile_a, tile_b)   int8 {0,1}
    emb_ref : (nb_pad, d_pad) bf16 if emb_resident else (tile_b, d_pad) bf16
              columns [0:D) = new_emb, column D = ones, rest zero-pad
    out_ref : (tile_a, d_pad)    f32, resident across k (accumulator)
    """
    k = pl.program_id(1)

    # int8 {0,1} -> bf16 is exact; the VPU upcast hides under the adj DMA.
    adj = adj_ref[...].astype(jnp.bfloat16)

    if emb_resident:
        start = pl.multiple_of(k * tile_b, tile_b)
        emb = emb_ref[pl.ds(start, tile_b), :]
    else:
        emb = emb_ref[...]

    # A @ [new_emb | ones | 0] on the MXU, bf16 operands, f32 accumulation.
    part = jnp.dot(adj, emb, preferred_element_type=jnp.float32)

    @pl.when(k == 0)
    def _init():
        out_ref[...] = part

    @pl.when(k != 0)
    def _accumulate():
        out_ref[...] += part

    @pl.when(k == pl.num_programs(1) - 1)
    def _finalize():
        acc = out_ref[...]
        # The ones-column carried the row sums through the same matmul (exact).
        row_sum = acc[:, d_col:d_col + 1]
        row_sum = jnp.where(row_sum == 0.0, 1.0, row_sum)
        inv = pl.reciprocal(row_sum, approx=True)
        out_ref[...] = acc * inv


# ----------------------------------------------------------------------------
# Config / hoisted preparation
# ----------------------------------------------------------------------------
class AggConfig(NamedTuple):
    node_num_a: int
    node_num_b: int
    b_dim: int
    tile_a: int
    tile_b: int
    na_pad: int
    nb_pad: int
    d_pad: int
    emb_resident: bool


def make_config(node_num_a, node_num_b, b_dim, *, tile_a=512, tile_b=2048,
                emb_resident=None):
    d_pad = _round_up(b_dim + 1, 128)                 # lane-dense out, +1 ones col
    tile_a = min(tile_a, _round_up(node_num_a, 32))   # int8 adj -> (32,128) packing
    tile_b = min(tile_b, _round_up(node_num_b, 128))
    # v7x megacore: keep >= 2 tiles along the "parallel" i-axis when Na can
    # split (harmless on single-core v5e/v6e).
    while _round_up(node_num_a, tile_a) // tile_a < 2 and tile_a > 256:
        tile_a = _round_up(tile_a // 2, 32)
    na_pad = _round_up(node_num_a, tile_a)
    nb_pad = _round_up(node_num_b, tile_b)
    if emb_resident is None:
        adj_dbuf = 2 * tile_a * tile_b                # int8, double-buffered
        out_dbuf = 2 * tile_a * d_pad * 4
        emb_resident = (nb_pad * d_pad * 2 + adj_dbuf + out_dbuf) <= 20 * 1024 * 1024
    return AggConfig(node_num_a, node_num_b, b_dim, tile_a, tile_b,
                     na_pad, nb_pad, d_pad, bool(emb_resident))


def prepare_adjacency(adj, cfg):
    """Hoisted pad + int8 cast of the dense {0,1} adjacency.  Call ONCE per
    graph and reuse across layers / iterations."""
    na, nb = adj.shape
    return jnp.pad(adj.astype(jnp.int8),
                   ((0, cfg.na_pad - na), (0, cfg.nb_pad - nb)))


# ----------------------------------------------------------------------------
# Wrapper
# ----------------------------------------------------------------------------
def mean_aggregator(adj_p, feature_b, weight, bias, cfg):
    """adj_p: (na_pad, nb_pad) int8 {0,1} (see prepare_adjacency);
    feature_b: (Nb, D) f32; weight: (D, D) torch-style (out, in); bias: (D,).
    Returns (Na, D) f32."""
    assert adj_p.shape == (cfg.na_pad, cfg.nb_pad) and adj_p.dtype == jnp.int8
    nb, d = cfg.node_num_b, cfg.b_dim

    # Hoisted linear transform: one grid-invariant XLA matmul.
    new_emb = (feature_b.astype(jnp.float32) @ weight.T.astype(jnp.float32)
               + bias.astype(jnp.float32))                        # (Nb, D)
    ones_col = jnp.ones((nb, 1), jnp.float32)
    emb_aug = jnp.concatenate([new_emb, ones_col], axis=1)        # (Nb, D+1)
    emb_p = jnp.pad(emb_aug.astype(jnp.bfloat16),                 # bf16 MXU operand
                    ((0, cfg.nb_pad - nb), (0, cfg.d_pad - (d + 1))))

    grid = (cfg.na_pad // cfg.tile_a, cfg.nb_pad // cfg.tile_b)

    if cfg.emb_resident:
        # DMA'd once, stays VMEM-resident for the whole grid.
        emb_spec = pl.BlockSpec((cfg.nb_pad, cfg.d_pad), lambda i, k: (0, 0))
        emb_hbm_bytes = emb_p.size * 2
    else:
        emb_spec = pl.BlockSpec((cfg.tile_b, cfg.d_pad), lambda i, k: (k, 0))
        emb_hbm_bytes = grid[0] * emb_p.size * 2

    cost = pl.CostEstimate(
        flops=int(2.0 * cfg.na_pad * cfg.nb_pad * cfg.d_pad),
        transcendentals=int(cfg.na_pad),
        bytes_accessed=int(adj_p.size                    # int8 adjacency stream
                           + emb_hbm_bytes
                           + cfg.na_pad * cfg.d_pad * 4),
    )

    kernel = functools.partial(mean_aggregator_kernel, d_col=d,
                               tile_b=cfg.tile_b, emb_resident=cfg.emb_resident)

    out_pad = pl.pallas_call(
        kernel,
        out_shape=jax.ShapeDtypeStruct((cfg.na_pad, cfg.d_pad), jnp.float32),
        grid_spec=pltpu.PrefetchScalarGridSpec(
            num_scalar_prefetch=0,
            grid=grid,
            in_specs=[
                pl.BlockSpec((cfg.tile_a, cfg.tile_b), lambda i, k: (i, k)),
                emb_spec,
            ],
            out_specs=pl.BlockSpec((cfg.tile_a, cfg.d_pad), lambda i, k: (i, 0)),
        ),
        compiler_params=pltpu.CompilerParams(
            dimension_semantics=("parallel", "arbitrary"),
            # Above the v5e/v6e/v7x scoped defaults, safely below v7x's
            # 64 MiB/TC; covers the <= ~20 MiB resident-emb budget + buffers.
            vmem_limit_bytes=40 * 1024 * 1024,
        ),
        cost_estimate=cost,
    )(adj_p, emb_p)

    return out_pad[:cfg.node_num_a, :cfg.b_dim]


# ----------------------------------------------------------------------------
# Host-side graph construction + reference
# ----------------------------------------------------------------------------
def build_edge_dic_list(key, node_num_a, node_num_b):
    edge_counts = jax.random.randint(key, (node_num_a,), 0, 6)
    edge_dic_list = {}
    for node in range(node_num_a):
        n_edges = int(edge_counts[node])
        if node == 3:
            n_edges = 0                     # exercise the row_sum == 0 -> 1 branch
        sub = jax.random.fold_in(key, node)
        neighs = jax.random.randint(sub, (n_edges,), 0, node_num_b)
        edge_dic_list[node] = [int(n) for n in neighs]
    return edge_dic_list


def build_dense_adjacency(edge_dic_list, node_num_a, node_num_b, cfg=None):
    """Host-side builder (edge_dic_list -> dense {0,1} matrix, equivalent to
    the torch.sparse_coo_tensor of ones).  With cfg it directly materializes
    the PADDED int8 adjacency the kernel consumes, so the pad/cast never runs
    in the per-call XLA path."""
    if cfg is None:
        shape, dtype = (node_num_a, node_num_b), np.float32
    else:
        shape, dtype = (cfg.na_pad, cfg.nb_pad), np.int8
    adj = np.zeros(shape, dtype=dtype)
    for node in range(node_num_a):
        for neigh in edge_dic_list[node]:
            adj[node, neigh] = 1
    return jnp.asarray(adj)


def reference(adj, feature_b, weight, bias):
    new_emb = feature_b @ weight.T + bias
    agg = adj @ new_emb
    row_sum = jnp.sum(adj, axis=-1, keepdims=True)
    row_sum = jnp.where(row_sum == 0.0, 1.0, row_sum)
    return agg / row_sum


def _run_case(key, node_num_a, node_num_b, b_dim, **cfg_kwargs):
    k_feat, k_w, k_b, k_edges = jax.random.split(key, 4)
    edge_dic_list = build_edge_dic_list(k_edges, node_num_a, node_num_b)

    cfg = make_config(node_num_a, node_num_b, b_dim, **cfg_kwargs)
    adj_p = build_dense_adjacency(edge_dic_list, node_num_a, node_num_b, cfg)   # padded int8 (hoisted)
    adj_f32 = build_dense_adjacency(edge_dic_list, node_num_a, node_num_b)      # reference only

    feature_b = jax.random.normal(k_feat, (node_num_b, b_dim), dtype=jnp.float32)
    # nn.Linear(b_dim, b_dim) parameters, deterministic init.
    weight = jax.random.normal(k_w, (b_dim, b_dim), dtype=jnp.float32) * 0.1
    bias = jax.random.normal(k_b, (b_dim,), dtype=jnp.float32) * 0.1

    out = jax.block_until_ready(mean_aggregator(adj_p, feature_b, weight, bias, cfg))
    ref = reference(adj_f32, feature_b, weight, bias)

    assert out.shape == (node_num_a, b_dim)
    # bf16 embedding operand + approx reciprocal -> relaxed vs the f32 reference.
    assert jnp.allclose(out, ref, atol=1e-2, rtol=1e-2), \
        float(jnp.max(jnp.abs(out - ref)))
    return out


if __name__ == "__main__":
    root = jax.random.PRNGKey(0)
    k1, k2 = jax.random.split(root)

    # Small single-tile case (grid 1x1, VMEM-resident embedding).
    _run_case(k1, node_num_a=16, node_num_b=24, b_dim=32)

    # Multi-tile case exercising the k-reduction accumulation into out_ref,
    # the multi-tile "parallel" i-axis and the tiled (non-resident) emb path.
    _run_case(k2, node_num_a=72, node_num_b=260, b_dim=32,
              tile_a=32, tile_b=128, emb_resident=False)

    print("KERNEL_OK")
</pallas_src>

<mosaic_0001>
module attributes {stable_mosaic.version = 11 : i64} {
  func.func @mean_aggregator_kernel(%arg0: i32, %arg1: i32, %arg2: memref<32x128xi8, #tpu.memory_space<vmem>>, %arg3: memref<128x128xbf16, #tpu.memory_space<vmem>>, %arg4: memref<32x128xf32, #tpu.memory_space<vmem>>) attributes {dimension_semantics = [#tpu.dimension_semantics<parallel>, #tpu.dimension_semantics<arbitrary>], iteration_bounds = array<i64: 1, 1>, scalar_prefetch = 0 : i64, scratch_operands = 0 : i64, tpu.core_type = #tpu.core_type<tc>, window_params = [{transform_indices = @transform_0, window_bounds = array<i64: 32, 128>}, {pipeline_mode = #tpu.pipeline_mode<synchronous>, transform_indices = @transform_1, window_bounds = array<i64: 128, 128>}, {transform_indices = @transform_2, window_bounds = array<i64: 32, 128>}]} {
    %c0 = arith.constant 0 : index
    %c0_0 = arith.constant 0 : index
    %0 = vector.load %arg2[%c0, %c0_0] : memref<32x128xi8, #tpu.memory_space<vmem>>, vector<32x128xi8>
    %1 = arith.sitofp %0 : vector<32x128xi8> to vector<32x128xbf16>
    %c128_i32 = arith.constant 128 : i32
    %2 = arith.muli %arg1, %c128_i32 : i32
    %3 = tpu.assume_multiple %2, 128 : i32
    %4 = arith.index_cast %3 : i32 to index
    %c0_1 = arith.constant 0 : index
    %5 = vector.load %arg3[%4, %c0_1] : memref<128x128xbf16, #tpu.memory_space<vmem>>, vector<128x128xbf16>
    %cst = arith.constant dense<0.000000e+00> : vector<32x128xf32>
    %6 = tpu.matmul %1, %5, %cst {dimension_numbers = #tpu.dot_dimension_numbers<[1], [0], [0], [1], [0, 0, 1, 1], [], []>} : vector<32x128xbf16>, vector<128x128xbf16>, vector<32x128xf32> -> vector<32x128xf32>
    %c0_i32 = arith.constant 0 : i32
    %7 = arith.cmpi eq, %arg1, %c0_i32 : i32
    %8 = arith.extui %7 : i1 to i32
    %c0_i32_2 = arith.constant 0 : i32
    %9 = arith.cmpi ne, %8, %c0_i32_2 : i32
    scf.if %9 {
      %c0_7 = arith.constant 0 : index
      %c0_8 = arith.constant 0 : index
      %16 = vector.load %arg4[%c0_7, %c0_8] : memref<32x128xf32, #tpu.memory_space<vmem>>, vector<32x128xf32>
      tpu.vector_store %arg4[%c0_7, %c0_8], %6 {strides = array<i32>} : memref<32x128xf32, #tpu.memory_space<vmem>>, vector<32x128xf32>,
    } else {
    }
    %c0_i32_3 = arith.constant 0 : i32
    %10 = arith.cmpi ne, %arg1, %c0_i32_3 : i32
    %11 = arith.extui %10 : i1 to i32
    %c0_i32_4 = arith.constant 0 : i32
    %12 = arith.cmpi ne, %11, %c0_i32_4 : i32
    scf.if %12 {
      %c0_7 = arith.constant 0 : index
      %c0_8 = arith.constant 0 : index
      %16 = vector.load %arg4[%c0_7, %c0_8] : memref<32x128xf32, #tpu.memory_space<vmem>>, vector<32x128xf32>
      %17 = arith.addf %16, %6 : vector<32x128xf32>
      %c0_9 = arith.constant 0 : index
      %c0_10 = arith.constant 0 : index
      %18 = vector.load %arg4[%c0_9, %c0_10] : memref<32x128xf32, #tpu.memory_space<vmem>>, vector<32x128xf32>
      tpu.vector_store %arg4[%c0_9, %c0_10], %17 {strides = array<i32>} : memref<32x128xf32, #tpu.memory_space<vmem>>, vector<32x128xf32>,
    } else {
    }
    %c0_i32_5 = arith.constant 0 : i32
    %13 = arith.cmpi eq, %arg1, %c0_i32_5 : i32
    %14 = arith.extui %13 : i1 to i32
    %c0_i32_6 = arith.constant 0 : i32
    %15 = arith.cmpi ne, %14, %c0_i32_6 : i32
    scf.if %15 {
      %c0_7 = arith.constant 0 : index
      %c0_8 = arith.constant 0 : index
      %16 = vector.load %arg4[%c0_7, %c0_8] : memref<32x128xf32, #tpu.memory_space<vmem>>, vector<32x128xf32>
      %17 = vector.extract_strided_slice %16 {offsets = [0, 32], sizes = [32, 1], strides = [1, 1]} : vector<32x128xf32> to vector<32x1xf32>
      %cst_9 = arith.constant 0.000000e+00 : f32
      %18 = vector.broadcast %cst_9 : f32 to vector<32x1xf32>
      %19 = arith.cmpf oeq, %17, %18 : vector<32x1xf32>
      %cst_10 = arith.constant 1.000000e+00 : f32
      %20 = vector.broadcast %cst_10 : f32 to vector<32x1xf32>
      %21 = arith.select %19, %20, %17 : vector<32x1xi1>, vector<32x1xf32>
      %22 = tpu.reciprocal %21 {approx = true} : vector<32x1xf32> -> vector<32x1xf32>
      %23 = vector.broadcast %22 : vector<32x1xf32> to vector<32x128xf32>
      %24 = arith.mulf %16, %23 : vector<32x128xf32>
      %c0_11 = arith.constant 0 : index
      %c0_12 = arith.constant 0 : index
      %25 = vector.load %arg4[%c0_11, %c0_12] : memref<32x128xf32, #tpu.memory_space<vmem>>, vector<32x128xf32>
      tpu.vector_store %arg4[%c0_11, %c0_12], %24 {strides = array<i32>} : memref<32x128xf32, #tpu.memory_space<vmem>>, vector<32x128xf32>,
    } else {
    }
    return
  }
  func.func @transform_0(%arg0: i32, %arg1: i32) -> (i32, i32) {
    %c0_i32 = arith.constant 0 : i32
    return %arg0, %arg1 : i32, i32
  }
  func.func @transform_1(%arg0: i32, %arg1: i32) -> (i32, i32) {
    %c0_i32 = arith.constant 0 : i32
    %c0_i32_0 = arith.constant 0 : i32
    %c0_i32_1 = arith.constant 0 : i32
    return %c0_i32, %c0_i32_0 : i32, i32
  }
  func.func @transform_2(%arg0: i32, %arg1: i32) -> (i32, i32) {
    %c0_i32 = arith.constant 0 : i32
    %c0_i32_0 = arith.constant 0 : i32
    return %arg0, %c0_i32 : i32, i32
  }
}

</mosaic_0001>

<bundles_post_ra>
// kernel: tpu_custom_call.1
= control target key start
LH: loop header
LB: loop body
LE: loop exit
PB: predicated region body
PF: predicated region fallthrough
CT: control target
= control target key end

     0   :  { %7 = vsyncpa [#allocation3], 0  ;;  %s453_s0 = inlined_call_operand.hbm [shape: s8[32,128], index: 0, kind: input, shape index: {}]   ;;  %s454_s1 = inlined_call_operand.hbm [shape: bf16[128,128], index: 1, kind: input, shape index: {}]   ;;  %s455_s2 = inlined_call_operand.hbm [shape: f32[32,128], index: 2, kind: output, shape index: {}]  }
   0x1   :  { %8 = vsyncpa [#allocation6], 0 }
   0x2   :  { %9 = vsyncpa [#allocation4], 0  ;;  %s387_s9 = smov [#allocation2]   ;;  %s388_s11 = smov [#allocation5]  }
   0x3   :  { %s16_s10 = sshll.u32 %s387_s9, 4  ;;  %s25_s12 = sshll.u32 %s388_s11, 4  ;;  %s17_s10 = int_to_ptr.vmem [resolvable:$true] %s16_s10  ;;  %s410_s12 = int_to_ptr.vmem [resolvable:$true] %s25_s12 }
   0x4   :  { %s315_s15 = scalar_lea.hbm %s453_s0, 128 }
   0x5   :  { %p316_p0 = scmp.ne.s32.totalorder %s453_s0, %s315_s15  ;;  %p319_p1 = scmp.lt.u32.totalorder %s315_s15, %s453_s0 }
   0x7   :  { %p321_p2 = pnand %p319_p1, %p316_p0 }
   0x9   :  { %324 = shalt.err (!%p321_p2)
}
   0xa   :  { %s325_s20 = scalar_lea.vmem %s17_s10, 128  ;;  %p330_p4 = scmp.lt.s32.totalorder %s17_s10, %s17_s10 }
   0xb   :  { %p326_p3 = scmp.ne.s32.totalorder %s17_s10, %s325_s20  ;;  %p331_p5 = scmp.lt.s32.totalorder %s325_s20, %s325_s20 }
   0xd   :  { %p332_p6 = por %p331_p5, %p330_p4 }
   0xf   :  { %p333_p7 = pnand %p332_p6, %p326_p3 }
  0x11   :  { %336 = shalt.err (!%p333_p7)
}
  0x12   :  { %19 = dma.hbm_to_vmem [thread:$0]  %s453_s0, 128, %s17_s10, [#allocation3]  }
  0x13   :  { %s337_s25 = scalar_lea.hbm %s454_s1, 1024 }
  0x14   :  { %p338_p8 = scmp.ne.s32.totalorder %s454_s1, %s337_s25  ;;  %p341_p9 = scmp.lt.u32.totalorder %s337_s25, %s454_s1 }
  0x16   :  { %p343_p10 = pnand %p341_p9, %p338_p8 }
  0x18   :  { %346 = shalt.err (!%p343_p10)
}
  0x19   :  { %s347_s30 = scalar_lea.vmem %s410_s12, 1024  ;;  %p352_p12 = scmp.lt.s32.totalorder %s410_s12, %s410_s12 }
  0x1a   :  { %p348_p11 = scmp.ne.s32.totalorder %s410_s12, %s347_s30  ;;  %p353_p13 = scmp.lt.s32.totalorder %s347_s30, %s347_s30 }
  0x1c   :  { %p354_p0 = por %p353_p13, %p352_p12 }
  0x1e   :  { %p355_p1 = pnand %p354_p0, %p348_p11 }
  0x20   :  { %358 = shalt.err (!%p355_p1)
}
  0x21   :  { %s389_s0 = smov 64   ;;  %s390_s3 = smov 4  }
  0x22   :  { %31 = dma.hbm_to_vmem [thread:$0]  %s454_s1, 1024, %s410_s12, [#allocation6], %s389_s0, %s389_s0, %s390_s3  }
  0x23   :  { %381 = dma.done.wait [#allocation3], 128  }
  0x24   :  { %382 = vsyncadd [#allocation3], 4294967168 }
  0x25   :  { %383 = dma.done.wait [#allocation6], 1024  }
  0x26   :  { %384 = vsyncadd [#allocation6], 4294966272  ;;  %v299_v0 = vld [vmem:[#allocation5] sm:$0xff]   ;;  %v300_v1 = vld [vmem:[#allocation5 + $0x8] sm:$0xff]   ;;  %v391_v11 = vmov 32   ;;  %s392_s1 = smov [#allocation7]  }
  0x27   :  { %269 = vmatprep.subr.bf16.mxu0 %v299_v0  ;;  %v301_v2 = vld [vmem:[#allocation5 + $0x10] sm:$0xff]   ;;  %v302_v3 = vld [vmem:[#allocation5 + $0x18] sm:$0xff]   ;;  %v303_v6 = vld [vmem:[#allocation5 + $0x20] sm:$0xff]   ;;  %298 = vset.pattern.permute.xlu1 %v391_v11  ;;  %s236_s6 = sshll.u32 %s392_s1, 4  ;;  %s237_s6 = int_to_ptr.vmem [resolvable:$true] %s236_s6 }
  0x28   :  { %270 = vmatpush3.bf16.msra.mxu0 %v299_v0  ;;  %v39_v4 = vld [vmem:[#allocation2] sm:$0xff]  ;;  %v304_v7 = vld [vmem:[#allocation5 + $0x28] sm:$0xff]   ;;  %v305_v8 = vld [vmem:[#allocation5 + $0x30] sm:$0xff]   ;;  %297 = vset.pattern.permute.xlu0 %v391_v11  ;;  %s359_s7 = scalar_lea.vmem %s237_s6, 512  ;;  %p364_p3 = scmp.lt.s32.totalorder %s237_s6, %s237_s6 }
  0x29   :  { %271 = vmatprep.subr.bf16.mxu0 %v300_v1  ;;  %v40_v5 = vunpack.c.l.s8.bf16 %v39_v4  ;;  %v306_v9 = vld [vmem:[#allocation5 + $0x38] sm:$0xff]   ;;  %v41_v10 = vunpack.c.h.s8.bf16 %v39_v4  ;;  %p360_p2 = scmp.ne.s32.totalorder %s237_s6, %s359_s7  ;;  %p365_p4 = scmp.lt.s32.totalorder %s359_s7, %s359_s7 }
  0x2b   :  { %285 = vmatprep.mubr.bf16.mxu0 %v40_v5  ;;  %p366_p5 = por %p365_p4, %p364_p3 }
  0x2c   :  { %272 = vmatpush3.bf16.msra.mxu0 %v300_v1 }
  0x2d   :  { %273 = vmatprep.subr.bf16.mxu0 %v301_v2  ;;  %p367_p6 = pnand %p366_p5, %p360_p2 }
  0x30   :  { %274 = vmatpush3.bf16.msra.mxu0 %v301_v2 }
  0x31   :  { %275 = vmatprep.subr.bf16.mxu0 %v302_v3 }
  0x34   :  { %276 = vmatpush3.bf16.msra.mxu0 %v302_v3 }
  0x35   :  { %277 = vmatprep.subr.bf16.mxu0 %v303_v6 }
  0x38   :  { %278 = vmatpush3.bf16.msra.mxu0 %v303_v6 }
  0x39   :  { %279 = vmatprep.subr.bf16.mxu0 %v304_v7 }
  0x3c   :  { %280 = vmatpush3.bf16.msra.mxu0 %v304_v7 }
  0x3d   :  { %281 = vmatprep.subr.bf16.mxu0 %v305_v8 }
  0x40   :  { %282 = vmatpush3.bf16.msra.mxu0 %v305_v8 }
  0x41   :  { %283 = vmatprep.subr.bf16.mxu0 %v306_v9 }
  0x44   :  { %284 = vmatpush3.bf16.msra.mxu0 %v306_v9 }
  0x47   :  { %286 = vmatmul.mubr.bf16.vlgmr.msra.gmra.mrb[0].mxu0 %v41_v10 }
 0x11a   :  { %v287_v12 = vpop.f32.mrb[0].mxu0 }
 0x11b   :  { %v145_v13 = vpop.f32.mrb[1].mxu0  ;;  %vm193_vm0 = vcmp.eq.f32.partialorder %v287_v12, 0.0 }
 0x11c   :  { %v288_v14 = vpop.f32.mrb[2].mxu0  ;;  %v197_v15 = vsel %vm193_vm0, 1.0, %v287_v12  ;;  %vm191_vm1 = vcmp.eq.f32.partialorder %v145_v13, 0.0 }
 0x11d   :  { %v148_v16 = vpop.f32.mrb[3].mxu0  ;;  %307 = vrcp.f32 %v197_v15  ;;  %v195_v17 = vsel %vm191_vm1, 1.0, %v145_v13  ;;  %vm194_vm2 = vcmp.eq.f32.partialorder %v288_v14, 0.0 }
 0x11e   :  { %309 = vrcp.f32 %v195_v17  ;;  %v198_v18 = vsel %vm194_vm2, 1.0, %v288_v14  ;;  %vm192_vm3 = vcmp.eq.f32.partialorder %v148_v16, 0.0 }
 0x11f   :  { %v196_v19 = vsel %vm192_vm3, 1.0, %v148_v16  ;;  %311 = vrcp.f32 %v198_v18 }
 0x120   :  { %313 = vrcp.f32 %v196_v19 }
 0x127   :  { %v308_v20 = vpop.eup %307 }
 0x128   :  { %v310_v21 = vpop.eup %309  ;;  %215 = vperm.xlu1 %298, %v308_v20  }
 0x129   :  { %205 = vperm.xlu0 %297, %v310_v21   ;;  %v312_v22 = vpop.eup %311 }
 0x12a   :  { %v314_v23 = vpop.eup %313 }
 0x12c   :  { %220 = vperm.xlu1 %298, %v312_v22  }
 0x12d   :  { %210 = vperm.xlu0 %297, %v314_v23  }
 0x1a7   :  { %v216_v24 = vpop.permute.xlu1 %215 }
 0x1a8   :  { %v225_v25 = vmul.f32 %v287_v12, %v216_v24  ;;  %v206_v26 = vpop.permute.xlu0 %205 }
 0x1a9   :  { %v223_v27 = vmul.f32 %v206_v26, %v145_v13 }
 0x1aa   :  { %229 = vst [vmem:[#allocation7 + $0x10] sm:$0xff] %v225_v25 }
 0x1ab   :  { %227 = vst [vmem:[#allocation7] sm:$0xff] %v223_v27  ;;  %v221_v28 = vpop.permute.xlu1 %220 }
 0x1ac   :  { %v226_v29 = vmul.f32 %v288_v14, %v221_v28  ;;  %v211_v30 = vpop.permute.xlu0 %210 }
 0x1ad   :  { %v224_v31 = vmul.f32 %v211_v30, %v148_v16 }
 0x1ae   :  { %230 = vst [vmem:[#allocation7 + $0x18] sm:$0xff] %v226_v29 }
 0x1af   :  { %228 = vst [vmem:[#allocation7 + $0x8] sm:$0xff] %v224_v31 }
 0x1b0   :  { %370 = shalt.err (!%p367_p6)
}
 0x1b1   :  { %s371_s10 = scalar_lea.hbm %s455_s2, 512 }
 0x1b2   :  { %p372_p7 = scmp.ne.s32.totalorder %s455_s2, %s371_s10  ;;  %p375_p8 = scmp.lt.u32.totalorder %s371_s10, %s455_s2 }
 0x1b4   :  { %p377_p9 = pnand %p375_p8, %p372_p7 }
 0x1b6   :  { %380 = shalt.err (!%p377_p9)
}
 0x1b7   :  { %s393_s15 = smov 128   ;;  %s394_s16 = smov 8  }
 0x1b8   :  { %242 = dma.vmem_to_hbm [thread:$0]  %s237_s6, 512, %s455_s2, [#allocation4], %s393_s15, %s393_s15, %s394_s16  }
 0x1b9   :  { %385 = dma.done.wait [#allocation4], 512  }
 0x1ba   :  { %386 = vsyncadd [#allocation4], 4294966784 }
 0x1bb   :  { %246 = vsyncpa [#allocation3], 1 }
 0x1bc   :  { %247 = vsyncpa [#allocation6], 1 }
 0x1bd   :  { %248 = vsyncpa [#allocation4], 1 }

</bundles_post_ra>
